<compile_context>
chip_gen: v5e
topology: v5e:2x2
jax: 0.10.0
libtpu: 0.0.40
codegen_flags: <defaults>
</compile_context>

<pallas_src>
import math
from dataclasses import dataclass, field
from functools import partial

import jax
import jax.numpy as jnp
from jax.experimental import pallas as pl
from jax.experimental.pallas import tpu as pltpu


# ----------------------------------------------------------------------------
# tiling helper
# ----------------------------------------------------------------------------
def _pick_tile(total, max_tile, align=128):
    """Largest multiple of `align` that divides `total` and is <= max_tile;
    falls back to `total` (full-extent blocks are always legal)."""
    if total <= max_tile and total % align == 0:
        return total
    t = (min(total, max_tile) // align) * align
    while t >= align:
        if total % t == 0:
            return t
        t -= align
    return total


# ----------------------------------------------------------------------------
# Kernel 1: encoder netE applied to every style image + style aggregation
#           (encode_w).  K-tiled matmul with a VMEM f32 accumulator.
# ----------------------------------------------------------------------------
def _encoder_kernel(x_ref, we_ref, be_ref, w_ref, acc_ref, *, n_style, aggr):
    # x_ref : (bs*n_style, tk)  f32   flattened style images, K tile
    # we_ref: (tk, wp)          bf16  K tile of We (wp = w_dim padded to 128)
    # be_ref: (1, wp)           f32
    # w_ref : (bs, wp)          f32   aggregated latent style (output)
    # acc_ref: (bs*n_style, wp) f32   VMEM accumulator scratch
    k = pl.program_id(0)

    @pl.when(k == 0)
    def _init():
        acc_ref[...] = jnp.zeros_like(acc_ref)

    acc_ref[...] += jnp.dot(x_ref[...], we_ref[...].astype(jnp.float32),
                            preferred_element_type=jnp.float32)

    @pl.when(k == pl.num_programs(0) - 1)
    def _finalize():
        h = acc_ref[...] + be_ref[...]                   # (bs*n_style, wp)
        bs = w_ref.shape[0]
        rows = []
        for b in range(bs):                              # static unroll, bs small
            hb = h[b * n_style:(b + 1) * n_style, :]
            if aggr == "mean":
                rows.append(jnp.mean(hb, axis=0, keepdims=True))
            else:                                        # 'max'
                rows.append(jnp.max(hb, axis=0, keepdims=True))
        w_ref[...] = jnp.concatenate(rows, axis=0)       # single lane-dense store


def encoder_forward(style_image, We_p, be_p, w_dim, aggr="mean"):
    """style_image: (bs, n_style, C, H, W) -> latent style w: (bs, w_dim)."""
    bs, n_style = style_image.shape[:2]
    D = math.prod(style_image.shape[2:])
    x = style_image.reshape(bs * n_style, D).astype(jnp.float32)  # free flatten
    wp = We_p.shape[1]                                   # padded latent width
    tk = _pick_tile(D, 2048)                             # K tile (VMEM-bounded)
    grid = (D // tk,)
    w_pad = pl.pallas_call(
        partial(_encoder_kernel, n_style=n_style, aggr=aggr),
        out_shape=jax.ShapeDtypeStruct((bs, wp), jnp.float32),
        grid=grid,
        in_specs=[
            pl.BlockSpec((bs * n_style, tk), lambda k: (0, k)),
            pl.BlockSpec((tk, wp), lambda k: (k, 0)),
            pl.BlockSpec((1, wp), lambda k: (0, 0)),
        ],
        out_specs=pl.BlockSpec((bs, wp), lambda k: (0, 0)),
        scratch_shapes=[pltpu.VMEM((bs * n_style, wp), jnp.float32)],
        compiler_params=pltpu.CompilerParams(
            dimension_semantics=("arbitrary",),          # K is a reduction
            vmem_limit_bytes=32 * 1024 * 1024),
    )(x, We_p, be_p)
    return w_pad[:, :w_dim]                              # drop lane padding


# ----------------------------------------------------------------------------
# Kernel 2: fused generator netG(label_map, latent_style)
#   embedding lookup (== one-hot scatter + 1x1 conv) -> style modulation by
#   (hoisted) gamma/beta -> ReLU -> output 1x1 conv -> tanh.
#   Channels on sublanes, pixels on lanes, HW tiled over the grid.
# ----------------------------------------------------------------------------
def _generator_kernel(label_ref, wc1t_ref, bc1_ref, gam_ref, bet_ref,
                      wc2_ref, bc2_ref, out_ref):
    # label_ref: (bs, T)            int8   spatial tile of the label map
    # wc1t_ref : (Ch, label_nc)     bf16   (= Wc1^T), VMEM-resident
    # bc1_ref  : (Ch, 1)            f32
    # gam_ref  : (Ch, bs)           f32    precomputed Wg^T @ w^T
    # bet_ref  : (Ch, bs)           f32    precomputed Wb^T @ w^T
    # wc2_ref  : (Ch, 1) or (out_c, Ch)    bf16
    # bc2_ref  : (out_c, 1)         f32
    # out_ref  : (bs*out_c, T)      f32    batch*channels packed on sublanes
    bs, t = label_ref.shape
    ch, label_nc = wc1t_ref.shape
    out_c = out_ref.shape[0] // bs

    lab = label_ref[...].astype(jnp.int32)               # (bs, T)
    wc1t = wc1t_ref[...].astype(jnp.float32)
    bc1 = bc1_ref[...]
    gam = gam_ref[...]
    bet = bet_ref[...]
    wc2 = wc2_ref[...].astype(jnp.float32)
    bc2 = bc2_ref[...]

    outs = []
    for b in range(bs):                                  # static unroll (bs small)
        lab_b = lab[b:b + 1, :]                          # (1, T)
        # Embedding gather Wc1[label] (== one-hot @ Wc1) via select-accumulate:
        # no one-hot ever hits HBM.  Out-of-range labels contribute nothing.
        # TODO(synk): for realistic label_nc (>~16) switch to an in-kernel
        # one-hot (broadcasted_iota == lab) + single MXU matmul instead.
        h = jnp.zeros((ch, t), jnp.float32)
        for c in range(label_nc):                        # static unroll (label_nc small)
            mask = (lab_b == c).astype(jnp.float32)      # (1, T)
            h = h + wc1t[:, c:c + 1] * mask              # (Ch,1)*(1,T)
        h = h + bc1
        # style modulation (gamma/beta hoisted to wrapper) + ReLU
        h = h * (1.0 + gam[:, b:b + 1]) + bet[:, b:b + 1]
        h = jnp.maximum(h, 0.0)
        # output 1x1 conv
        if out_c == 1:
            # sublane reduce (XLU) instead of an M=1 MXU push
            o = jnp.sum(h * wc2, axis=0, keepdims=True) + bc2          # (1, T)
        else:
            # wc2 is pre-transposed (out_c, Ch): contraction is (K of LHS, Ch of RHS)
            o = jax.lax.dot_general(wc2, h, (((1,), (0,)), ((), ())),
                                    preferred_element_type=jnp.float32) + bc2
        outs.append(o)
    # single lane-dense store per tile (T multiple of 128 / full extent)
    out_ref[...] = jnp.tanh(jnp.concatenate(outs, axis=0))


def generator_forward(label_flat, w, params):
    """label_flat: (bs, H*W) int8, w: (bs, w_dim) -> fake image (bs*out_c, H*W)."""
    bs, hw = label_flat.shape
    ch = params["Wc1T"].shape[0]
    out_c = params["Wc2"].shape[1]

    # hoisted per-batch modulation (tiny wrapper-side matmuls, computed once)
    wT = jnp.transpose(w.astype(jnp.float32))            # (w_dim, bs)
    gam = jnp.dot(params["WgT"], wT)                     # (Ch, bs) f32
    bet = jnp.dot(params["WbT"], wT)                     # (Ch, bs) f32

    # Wc2 layout: (Ch, 1) for the sublane-reduce path, (out_c, Ch) for the MXU path
    wc2_arg = params["Wc2"] if out_c == 1 else jnp.transpose(params["Wc2"])

    T = _pick_tile(hw, 1024)                             # keep (Ch,T) f32 in vregs
    grid = (hw // T,)

    return pl.pallas_call(
        _generator_kernel,
        out_shape=jax.ShapeDtypeStruct((bs * out_c, hw), jnp.float32),
        grid=grid,
        in_specs=[
            pl.BlockSpec((bs, T), lambda i: (0, i)),                 # label tile
            pl.BlockSpec(params["Wc1T"].shape, lambda i: (0, 0)),    # VMEM-resident
            pl.BlockSpec(params["bc1"].shape, lambda i: (0, 0)),
            pl.BlockSpec((ch, bs), lambda i: (0, 0)),
            pl.BlockSpec((ch, bs), lambda i: (0, 0)),
            pl.BlockSpec(wc2_arg.shape, lambda i: (0, 0)),
            pl.BlockSpec(params["bc2"].shape, lambda i: (0, 0)),
        ],
        out_specs=pl.BlockSpec((bs * out_c, T), lambda i: (0, i)),
        compiler_params=pltpu.CompilerParams(
            dimension_semantics=("parallel",),           # shards HW tiles across TCs
            vmem_limit_bytes=32 * 1024 * 1024),
    )(label_flat, params["Wc1T"], params["bc1"], gam, bet, wc2_arg, params["bc2"])


# ----------------------------------------------------------------------------
# Model wrapper mirroring Pix2PixModel.forward (inference / encode_only modes)
# ----------------------------------------------------------------------------
@dataclass
class Options:
    label_nc: int = 4
    w_dim: int = 32
    ngf: int = 32
    output_nc: int = 1
    style_aggr_method: str = "mean"
    gpu_ids: tuple = field(default_factory=tuple)
    isTrain: bool = False


class Pix2PixModelPallas:
    def __init__(self, opt: Options, key):
        self.opt = opt
        k = jax.random.split(key, 6)
        D = 1 * 16 * 16  # encoder flattened input (C*H*W of a style image)
        s = 0.05
        wp = max(128, ((opt.w_dim + 127) // 128) * 128)  # latent width padded to lanes
        self.w_pad = wp
        # netE (synthetic): one dense layer; weight stored bf16, lane-padded
        We = s * jax.random.normal(k[0], (D, opt.w_dim), jnp.float32)
        self.enc_We = jnp.pad(We, ((0, 0), (0, wp - opt.w_dim))).astype(jnp.bfloat16)
        self.enc_be = jnp.zeros((1, wp), jnp.float32)
        # netG (synthetic): 1x1 conv -> style modulation -> ReLU -> 1x1 conv -> tanh
        # Weights stored channels-major (transposed), MXU operands in bf16.
        self.gen = {
            "Wc1T": (s * jax.random.normal(k[1], (opt.ngf, opt.label_nc),
                                           jnp.float32)).astype(jnp.bfloat16),
            "bc1": jnp.zeros((opt.ngf, 1), jnp.float32),
            "WgT": s * jax.random.normal(k[2], (opt.ngf, opt.w_dim), jnp.float32),
            "WbT": s * jax.random.normal(k[3], (opt.ngf, opt.w_dim), jnp.float32),
            "Wc2": (s * jax.random.normal(k[4], (opt.ngf, opt.output_nc),
                                          jnp.float32)).astype(jnp.bfloat16),
            "bc2": jnp.zeros((opt.output_nc, 1), jnp.float32),
        }

    # --- preprocess_input: label map -> flattened int8 labels -------------------
    # (the one-hot scatter is fused into the generator kernel as an embedding
    #  gather, so no (bs, label_nc, H, W) tensor is materialized)
    def preprocess_input(self, data):
        label = data["label"].astype(jnp.int32)
        if label.ndim == 3:
            label = label[None]
        bs, _, H, W = label.shape
        # narrow label stream to int8 (label_nc << 128) to cut label DMA 4x
        label_flat = label[:, 0].reshape(bs, H * W).astype(jnp.int8)
        # TODO(synk): labels outside [0, label_nc) yield an all-zero embedding row
        # (PyTorch scatter_ would raise); clamp here if strictness is required.
        target = data.get("target", None)
        return label_flat, (H, W), data["style_image"], target

    # --- encode_w (real_image must be 5-D: bs, n_style, C, H, W) ---------------
    def encode_w(self, real_image):
        if real_image.ndim != 5:
            raise ValueError("real_image should have 5 dimensions")
        if self.opt.style_aggr_method not in ("mean", "max"):
            raise ValueError(
                f"Aggregation method not found: {self.opt.style_aggr_method}")
        w = encoder_forward(real_image, self.enc_We, self.enc_be, self.opt.w_dim,
                            aggr=self.opt.style_aggr_method)
        features = None  # TODO(synk): intermediate encoder feature maps not modeled
        return w, features

    def generate_fake_from_stylecode(self, label_flat, hw, latent_style):
        H, W = hw
        fake = generator_forward(label_flat, latent_style, self.gen)  # (bs*C, H*W)
        bs = label_flat.shape[0]
        return fake.reshape(bs, self.opt.output_nc, H, W)             # NCHW, free

    def generate_fake(self, label_flat, hw, style_image):
        latent_style, features = self.encode_w(style_image)
        fake = self.generate_fake_from_stylecode(label_flat, hw, latent_style)
        return fake, latent_style, features

    def forward(self, data, mode):
        label_flat, hw, style_image, _ = self.preprocess_input(data)
        if mode == "inference":
            if "latent_style" in data:
                return self.generate_fake_from_stylecode(label_flat, hw,
                                                         data["latent_style"])
            fake, _, _ = self.generate_fake(label_flat, hw, style_image)
            return fake
        elif mode == "encode_only":
            w, _ = self.encode_w(style_image)
            return w
        else:
            # TODO(synk): 'generator'/'discriminator' training losses not implemented
            raise ValueError("|mode| is invalid")


if __name__ == "__main__":
    key = jax.random.PRNGKey(0)
    k_lab, k_sty, k_par = jax.random.split(key, 3)

    bs, H, W = 2, 16, 16
    n_style, style_c = 2, 1
    opt = Options()

    data = {
        "label": jax.random.randint(k_lab, (bs, 1, H, W), 0, opt.label_nc, jnp.int32),
        "style_image": jax.random.normal(k_sty, (bs, n_style, style_c, H, W),
                                         jnp.float32),
    }

    model = Pix2PixModelPallas(opt, k_par)

    fake_image = model.forward(data, mode="inference")      # (bs, output_nc, H, W)
    latent_w = model.forward(data, mode="encode_only")      # (bs, w_dim)

    jax.block_until_ready(fake_image)
    jax.block_until_ready(latent_w)

    assert fake_image.shape == (bs, opt.output_nc, H, W)
    assert latent_w.shape == (bs, opt.w_dim)
    assert bool(jnp.all(jnp.isfinite(fake_image)))
    assert bool(jnp.all(jnp.isfinite(latent_w)))
    print("KERNEL_OK")
</pallas_src>

<mosaic_0001>
module attributes {stable_mosaic.version = 11 : i64} {
  func.func @_encoder_kernel(%arg0: i32, %arg1: memref<4x256xf32, #tpu.memory_space<vmem>>, %arg2: memref<256x128xbf16, #tpu.memory_space<vmem>>, %arg3: memref<1x128xf32, #tpu.memory_space<vmem>>, %arg4: memref<2x128xf32, #tpu.memory_space<vmem>>, %arg5: memref<4x128xf32, #tpu.memory_space<vmem>>) attributes {dimension_semantics = [#tpu.dimension_semantics<arbitrary>], iteration_bounds = array<i64: 1>, scalar_prefetch = 0 : i64, scratch_operands = 1 : i64, tpu.core_type = #tpu.core_type<tc>, window_params = [{transform_indices = @transform_0, window_bounds = array<i64: 4, 256>}, {transform_indices = @transform_1, window_bounds = array<i64: 256, 128>}, {pipeline_mode = #tpu.pipeline_mode<synchronous>, transform_indices = @transform_2, window_bounds = array<i64: 1, 128>}, {pipeline_mode = #tpu.pipeline_mode<synchronous>, transform_indices = @transform_3, window_bounds = array<i64: 2, 128>}]} {
    %c0_i32 = arith.constant 0 : i32
    %0 = arith.cmpi eq, %arg0, %c0_i32 : i32
    %1 = arith.extui %0 : i1 to i32
    %c0_i32_0 = arith.constant 0 : i32
    %2 = arith.cmpi ne, %1, %c0_i32_0 : i32
    scf.if %2 {
      %cst_10 = arith.constant 0.000000e+00 : f32
      %13 = vector.broadcast %cst_10 : f32 to vector<4x128xf32>
      %c0_11 = arith.constant 0 : index
      %c0_12 = arith.constant 0 : index
      %14 = vector.load %arg5[%c0_11, %c0_12] : memref<4x128xf32, #tpu.memory_space<vmem>>, vector<4x128xf32>
      tpu.vector_store %arg5[%c0_11, %c0_12], %13 {strides = array<i32>} : memref<4x128xf32, #tpu.memory_space<vmem>>, vector<4x128xf32>,
    } else {
    }
    %c0 = arith.constant 0 : index
    %c0_1 = arith.constant 0 : index
    %3 = vector.load %arg5[%c0, %c0_1] : memref<4x128xf32, #tpu.memory_space<vmem>>, vector<4x128xf32>
    %c0_2 = arith.constant 0 : index
    %c0_3 = arith.constant 0 : index
    %4 = vector.load %arg1[%c0_2, %c0_3] : memref<4x256xf32, #tpu.memory_space<vmem>>, vector<4x256xf32>
    %c0_4 = arith.constant 0 : index
    %c0_5 = arith.constant 0 : index
    %5 = vector.load %arg2[%c0_4, %c0_5] : memref<256x128xbf16, #tpu.memory_space<vmem>>, vector<256x128xbf16>
    %6 = arith.extf %5 : vector<256x128xbf16> to vector<256x128xf32>
    %cst = arith.constant dense<0.000000e+00> : vector<4x128xf32>
    %7 = tpu.matmul %4, %6, %cst {dimension_numbers = #tpu.dot_dimension_numbers<[1], [0], [0], [1], [0, 0, 1, 1], [], []>} : vector<4x256xf32>, vector<256x128xf32>, vector<4x128xf32> -> vector<4x128xf32>
    %8 = arith.addf %3, %7 : vector<4x128xf32>
    %c0_6 = arith.constant 0 : index
    %c0_7 = arith.constant 0 : index
    %9 = vector.load %arg5[%c0_6, %c0_7] : memref<4x128xf32, #tpu.memory_space<vmem>>, vector<4x128xf32>
    tpu.vector_store %arg5[%c0_6, %c0_7], %8 {strides = array<i32>} : memref<4x128xf32, #tpu.memory_space<vmem>>, vector<4x128xf32>,
    %c0_i32_8 = arith.constant 0 : i32
    %10 = arith.cmpi eq, %arg0, %c0_i32_8 : i32
    %11 = arith.extui %10 : i1 to i32
    %c0_i32_9 = arith.constant 0 : i32
    %12 = arith.cmpi ne, %11, %c0_i32_9 : i32
    scf.if %12 {
      %c0_10 = arith.constant 0 : index
      %c0_11 = arith.constant 0 : index
      %13 = vector.load %arg5[%c0_10, %c0_11] : memref<4x128xf32, #tpu.memory_space<vmem>>, vector<4x128xf32>
      %c0_12 = arith.constant 0 : index
      %c0_13 = arith.constant 0 : index
      %14 = vector.load %arg3[%c0_12, %c0_13] : memref<1x128xf32, #tpu.memory_space<vmem>>, vector<1x128xf32>
      %15 = vector.broadcast %14 : vector<1x128xf32> to vector<4x128xf32>
      %16 = arith.addf %13, %15 : vector<4x128xf32>
      %17 = vector.extract_strided_slice %16 {offsets = [0, 0], sizes = [2, 128], strides = [1, 1]} : vector<4x128xf32> to vector<2x128xf32>
      %cst_14 = arith.constant dense<0.000000e+00> : vector<128xf32>
      %18 = vector.multi_reduction <add>, %17, %cst_14 [0] : vector<2x128xf32> to vector<128xf32>
      %19 = vector.shape_cast %18 : vector<128xf32> to vector<1x128xf32>
      %cst_15 = arith.constant 2.000000e+00 : f32
      %20 = vector.broadcast %cst_15 : f32 to vector<1x128xf32>
      %21 = arith.divf %19, %20 : vector<1x128xf32>
      %22 = vector.extract_strided_slice %16 {offsets = [2, 0], sizes = [2, 128], strides = [1, 1]} : vector<4x128xf32> to vector<2x128xf32>
      %cst_16 = arith.constant dense<0.000000e+00> : vector<128xf32>
      %23 = vector.multi_reduction <add>, %22, %cst_16 [0] : vector<2x128xf32> to vector<128xf32>
      %24 = vector.shape_cast %23 : vector<128xf32> to vector<1x128xf32>
      %cst_17 = arith.constant 2.000000e+00 : f32
      %25 = vector.broadcast %cst_17 : f32 to vector<1x128xf32>
      %26 = arith.divf %24, %25 : vector<1x128xf32>
      %27 = tpu.concatenate %21, %26 in 0 : vector<1x128xf32>, vector<1x128xf32> -> vector<2x128xf32>
      %c0_18 = arith.constant 0 : index
      %c0_19 = arith.constant 0 : index
      %28 = vector.load %arg4[%c0_18, %c0_19] : memref<2x128xf32, #tpu.memory_space<vmem>>, vector<2x128xf32>
      tpu.vector_store %arg4[%c0_18, %c0_19], %27 {strides = array<i32>} : memref<2x128xf32, #tpu.memory_space<vmem>>, vector<2x128xf32>,
    } else {
    }
    return
  }
  func.func @transform_0(%arg0: i32) -> (i32, i32) {
    %c0_i32 = arith.constant 0 : i32
    %c0_i32_0 = arith.constant 0 : i32
    return %c0_i32, %arg0 : i32, i32
  }
  func.func @transform_1(%arg0: i32) -> (i32, i32) {
    %c0_i32 = arith.constant 0 : i32
    %c0_i32_0 = arith.constant 0 : i32
    return %arg0, %c0_i32 : i32, i32
  }
  func.func @transform_2(%arg0: i32) -> (i32, i32) {
    %c0_i32 = arith.constant 0 : i32
    %c0_i32_0 = arith.constant 0 : i32
    %c0_i32_1 = arith.constant 0 : i32
    return %c0_i32, %c0_i32_0 : i32, i32
  }
  func.func @transform_3(%arg0: i32) -> (i32, i32) {
    %c0_i32 = arith.constant 0 : i32
    %c0_i32_0 = arith.constant 0 : i32
    %c0_i32_1 = arith.constant 0 : i32
    return %c0_i32, %c0_i32_0 : i32, i32
  }
}

</mosaic_0001>

<bundles_post_ra>
// kernel: tpu_custom_call.1
= control target key start
LH: loop header
LB: loop body
LE: loop exit
PB: predicated region body
PF: predicated region fallthrough
CT: control target
= control target key end

     0   :  { %8 = vsyncpa [#allocation4], 0  ;;  %s427_s0 = inlined_call_operand.hbm [shape: f32[4,256], index: 0, kind: input, shape index: {}]   ;;  %s428_s1 = inlined_call_operand.hbm [shape: bf16[256,128], index: 1, kind: input, shape index: {}]   ;;  %s429_s2 = inlined_call_operand.vmem [shape: f32[1,128], index: 2, kind: input, shape index: {}]   ;;  %s430_s3 = inlined_call_operand.hbm [shape: f32[2,128], index: 3, kind: output, shape index: {}]  }
   0x1   :  { %9 = vsyncpa [#allocation7], 0 }
   0x2   :  { %10 = vsyncpa [#allocation5], 0  ;;  %s16_s14 = sshll.u32 %s427_s0, 4  ;;  %s388_s15 = smov [#allocation3]   ;;  %s17_s14 = int_to_ptr.hbm [resolvable:$true] %s16_s14 }
   0x3   :  { %s18_s16 = sshll.u32 %s388_s15, 4  ;;  %s26_s19 = sshll.u32 %s428_s1, 4  ;;  %s19_s16 = int_to_ptr.vmem [resolvable:$true] %s18_s16  ;;  %s27_s19 = int_to_ptr.hbm [resolvable:$true] %s26_s19 }
   0x4   :  { %21 = dma.hbm_to_vmem [thread:$0]  %s17_s14, 128, %s19_s16, [#allocation4]  }
   0x5   :  { %s389_s20 = smov [#allocation6]   ;;  %s390_s22 = smov 64  }
   0x6   :  { %s28_s21 = sshll.u32 %s389_s20, 4  ;;  %s391_s23 = smov 4   ;;  %s29_s21 = int_to_ptr.vmem [resolvable:$true] %s28_s21 }
   0x7   :  { %34 = dma.hbm_to_vmem [thread:$0]  %s27_s19, 2048, %s29_s21, [#allocation7], %s390_s22, %s390_s22, %s391_s23  }
   0x8   :  { %382 = dma.done.wait [#allocation4], 128  }
   0x9   :  { %383 = vsyncadd [#allocation4], 4294967168 }
   0xa   :  { %384 = dma.done.wait [#allocation7], 2048  }
   0xb   :  { %385 = vsyncadd [#allocation7], 4294965248  ;;  %v291_v0 = vld [vmem:[#allocation6 + $0x38] sm:$0xff]   ;;  %v290_v2 = vld [vmem:[#allocation6 + $0x30] sm:$0xff]   ;;  %v392_v51 = vmov 0.0   ;;  %v393_v56 = vmov 2.0  }
   0xc   :  { %v299_v1 = vld [vmem:[#allocation6 + $0x78] sm:$0xff]   ;;  %v252_v3 = vunpack.c.h.bf16 %v291_v0  ;;  %v251_v5 = vunpack.c.l.bf16 %v291_v0  ;;  %v298_v7 = vld [vmem:[#allocation6 + $0x70] sm:$0xff]   ;;  %v248_v8 = vunpack.c.h.bf16 %v290_v2  ;;  %v289_v10 = vld [vmem:[#allocation6 + $0x28] sm:$0xff]   ;;  %v247_v12 = vunpack.c.l.bf16 %v290_v2  ;;  %49 = vst [vmem:[#allocation2] sm:$0xf] %v392_v51  ;;  %s210_s27 = sshll.u32 %s430_s3, 4  ;;  %s211_s27 = int_to_ptr.hbm [resolvable:$true] %s210_s27 }
   0xd   :  { %v284_v4 = vunpack.c.h.bf16 %v299_v1  ;;  %v283_v6 = vunpack.c.l.bf16 %v299_v1  ;;  %v280_v9 = vunpack.c.h.bf16 %v298_v7  ;;  %v297_v11 = vld [vmem:[#allocation6 + $0x68] sm:$0xff]   ;;  %v279_v13 = vunpack.c.l.bf16 %v298_v7  ;;  %v51_v14 = vld [vmem:[#allocation3] sm:$0xff]  ;;  %v288_v17 = vld [vmem:[#allocation6 + $0x20] sm:$0xff]  }
   0xe   :  { %122 = vmatpush.msra.mxu0 %v252_v3  ;;  %117 = vst [vmem:[#allocation1] ss:$2 sm:$0xff] %v51_v14  ;;  %v244_v15 = vunpack.c.h.bf16 %v289_v10  ;;  %v276_v16 = vunpack.c.h.bf16 %v297_v11  ;;  %v296_v18 = vld [vmem:[#allocation6 + $0x60] sm:$0xff]   ;;  %v243_v19 = vunpack.c.l.bf16 %v289_v10  ;;  %v275_v20 = vunpack.c.l.bf16 %v297_v11  ;;  %v287_v23 = vld [vmem:[#allocation6 + $0x18] sm:$0xff]   ;;  %v286_v29 = vld [vmem:[#allocation6 + $0x10] sm:$0xff]  }
   0xf   :  { %142 = vmatpush.msra.mxu1 %v284_v4  ;;  %v240_v21 = vunpack.c.h.bf16 %v288_v17  ;;  %v272_v22 = vunpack.c.h.bf16 %v296_v18  ;;  %v295_v24 = vld [vmem:[#allocation6 + $0x58] sm:$0xff]   ;;  %v239_v25 = vunpack.c.l.bf16 %v288_v17  ;;  %v271_v26 = vunpack.c.l.bf16 %v296_v18  ;;  %v294_v30 = vld [vmem:[#allocation6 + $0x50] sm:$0xff]   ;;  %v285_v35 = vld [vmem:[#allocation6 + $0x8] sm:$0xff]  }
  0x10   :  { %123 = vmatpush.msra.mxu0 %v251_v5  ;;  %v236_v27 = vunpack.c.h.bf16 %v287_v23  ;;  %v268_v28 = vunpack.c.h.bf16 %v295_v24  ;;  %v235_v31 = vunpack.c.l.bf16 %v287_v23  ;;  %v267_v32 = vunpack.c.l.bf16 %v295_v24  ;;  %v293_v36 = vld [vmem:[#allocation6 + $0x48] sm:$0xff]   ;;  %v222_v41 = vld [vmem:[#allocation6] sm:$0xff]  }
  0x11   :  { %143 = vmatpush.msra.mxu1 %v283_v6  ;;  %v232_v33 = vunpack.c.h.bf16 %v286_v29  ;;  %v264_v34 = vunpack.c.h.bf16 %v294_v30  ;;  %v231_v37 = vunpack.c.l.bf16 %v286_v29  ;;  %v263_v38 = vunpack.c.l.bf16 %v294_v30  ;;  %v292_v42 = vld [vmem:[#allocation6 + $0x40] sm:$0xff]   ;;  %v307_v59 = vld [vmem:[%s429_s2] ss:$0 sm:$0xff]  ;;  %s394_s2 = smov [#allocation8]  }
  0x12   :  { %124 = vmatpush.msra.mxu0 %v248_v8  ;;  %v228_v39 = vunpack.c.h.bf16 %v285_v35  ;;  %v260_v40 = vunpack.c.h.bf16 %v293_v36  ;;  %v227_v43 = vunpack.c.l.bf16 %v285_v35  ;;  %v259_v44 = vunpack.c.l.bf16 %v293_v36  ;;  %s208_s24 = sshll.u32 %s394_s2, 4  ;;  %s209_s24 = int_to_ptr.vmem [resolvable:$true] %s208_s24 }
  0x13   :  { %144 = vmatpush.msra.mxu1 %v280_v9  ;;  %v224_v45 = vunpack.c.h.bf16 %v222_v41  ;;  %v256_v46 = vunpack.c.h.bf16 %v292_v42  ;;  %v223_v47 = vunpack.c.l.bf16 %v222_v41  ;;  %v255_v48 = vunpack.c.l.bf16 %v292_v42  ;;  %v50_v53 = vld [vmem:[#allocation2] sm:$0xf] }
  0x14   :  { %125 = vmatpush.msra.mxu0 %v247_v12  ;;  %308 = vrcp.f32 %v393_v56  ;;  %vm173_vm0 = vcmask 1041408   ;;  %vm200_vm2 = vcmask 1040384  }
  0x15   :  { %145 = vmatpush.msra.mxu1 %v279_v13  ;;  %v118_v49 = vld.sshfl [vmem:[#allocation1] sm:$0xff pattern:$0x75316420]  ;;  %v119_v50 = vld.sshfl [vmem:[#allocation1 + $0x8] sm:$0xff pattern:$0x75316420] }
  0x16   :  { %126 = vmatpush.msra.mxu0 %v244_v15 }
  0x17   :  { %146 = vmatpush.msra.mxu1 %v276_v16 }
  0x18   :  { %127 = vmatpush.msra.mxu0 %v243_v19 }
  0x19   :  { %147 = vmatpush.msra.mxu1 %v275_v20 }
  0x1a   :  { %128 = vmatpush.msra.mxu0 %v240_v21  ;;  %v309_v58 = vpop.eup %308 }
  0x1b   :  { %148 = vmatpush.msra.mxu1 %v272_v22  ;;  %v182_v60 = vmul.f32 2.0, %v309_v58  ;;  %vm186_vm1 = vweird.f32 %v309_v58 }
  0x1c   :  { %129 = vmatpush.msra.mxu0 %v239_v25 }
  0x1d   :  { %149 = vmatpush.msra.mxu1 %v271_v26  ;;  %v183_v0 = vsub.f32 1.0, %v182_v60 }
  0x1e   :  { %130 = vmatpush.msra.mxu0 %v236_v27 }
  0x1f   :  { %150 = vmatpush.msra.mxu1 %v268_v28  ;;  %v184_v6 = vmul.f32 %v309_v58, %v183_v0 }
  0x20   :  { %131 = vmatpush.msra.mxu0 %v235_v31 }
  0x21   :  { %151 = vmatpush.msra.mxu1 %v267_v32  ;;  %v185_v11 = vadd.f32 %v309_v58, %v184_v6 }
  0x22   :  { %132 = vmatpush.msra.mxu0 %v232_v33 }
  0x23   :  { %152 = vmatpush.msra.mxu1 %v264_v34  ;;  %v187_v16 = vsel %vm186_vm1, %v309_v58, %v185_v11 }
  0x24   :  { %133 = vmatpush.msra.mxu0 %v231_v37 }
  0x25   :  { %153 = vmatpush.msra.mxu1 %v263_v38 }
  0x26   :  { %134 = vmatpush.msra.mxu0 %v228_v39 }
  0x27   :  { %154 = vmatpush.msra.mxu1 %v260_v40 }
  0x28   :  { %135 = vmatpush.msra.mxu0 %v227_v43 }
  0x29   :  { %155 = vmatpush.msra.mxu1 %v259_v44 }
  0x2a   :  { %136 = vmatpush.msra.mxu0 %v224_v45 }
  0x2b   :  { %156 = vmatpush.msra.mxu1 %v256_v46 }
  0x2c   :  { %137 = vmatpush.msra.mxu0 %v223_v47 }
  0x2d   :  { %157 = vmatpush.msra.mxu1 %v255_v48  ;;  %138 = vmatmul.f32.vlgmr.msra.gmra.mxu0 %v118_v49 }
  0x2e   :  { %158 = vmatmul.f32.vlgmr.msra.gmra.mxu1 %v119_v50 }
  0xaa   :  { %v139_v52 = vpop.f32.mrf.mxu0 }
  0xab   :  { %v159_v54 = vpop.f32.mrf.mxu1 }
  0xac   :  { %v160_v55 = vadd.f32 %v159_v54, %v139_v52 }
  0xae   :  { %v162_v57 = vadd.f32 %v160_v55, %v50_v53 }
  0xb0   :  { %163 = vst [vmem:[#allocation2] sm:$0xf] %v162_v57 }
  0xb7   :  { %v167_v61 = vld [vmem:[#allocation2] sm:$0xf] }
  0xb8   :  { %v172_v62 = vadd.f32 %v307_v59, %v167_v61 }
  0xba   :  { %v174_v63 = vsel %vm173_vm0, %v172_v62, 0.0  ;;  %v190_v1 = vrot.slane %v172_v62, 2 }
  0xbb   :  { %v175_v2 = vrot.slane %v174_v63, 4 }
  0xbc   :  { %v192_v3 = vsel %vm173_vm0, %v190_v1, 0.0 }
  0xbd   :  { %v176_v4 = vadd.f32 %v175_v2, %v174_v63  ;;  %v193_v5 = vrot.slane %v192_v3, 4 }
  0xbf   :  { %v177_v7 = vrot.slane %v176_v4, 2  ;;  %v194_v8 = vadd.f32 %v193_v5, %v192_v3 }
  0xc1   :  { %v178_v9 = vadd.f32 %v177_v7, %v176_v4  ;;  %v195_v10 = vrot.slane %v194_v8, 2 }
  0xc3   :  { %v179_v12 = vrot.slane %v178_v9, 1  ;;  %v196_v13 = vadd.f32 %v195_v10, %v194_v8 }
  0xc5   :  { %v180_v14 = vadd.f32 %v179_v12, %v178_v9  ;;  %v197_v15 = vrot.slane %v196_v13, 1 }
  0xc7   :  { %v198_v17 = vadd.f32 %v197_v15, %v196_v13  ;;  %v188_v18 = vmul.f32 %v187_v16, %v180_v14 }
  0xc9   :  { %v199_v19 = vmul.f32 %v198_v17, %v187_v16 }
  0xcb   :  { %v201_v20 = vsel %vm200_vm2, %v188_v18, %v199_v19 }
  0xcc   :  { %202 = vst [vmem:[#allocation8] sm:$0x3] %v201_v20 }
  0xcd   :  { %213 = dma.vmem_to_hbm [thread:$0]  %s209_s24, 32, %s211_s27, [#allocation5]  }
  0xce   :  { %386 = dma.done.wait [#allocation5], 32  }
  0xcf   :  { %387 = vsyncadd [#allocation5], 4294967264 }
  0xd0   :  { %218 = vsyncpa [#allocation4], 1 }
  0xd1   :  { %219 = vsyncpa [#allocation7], 1 }
  0xd2   :  { %220 = vsyncpa [#allocation5], 1 }

</bundles_post_ra>
